<compile_context>
chip_gen: v6e
topology: v6e:2x2x1
jax: 0.10.0
libtpu: 0.0.40
codegen_flags: <defaults>
</compile_context>

<pallas_src>
import functools

import jax
import jax.numpy as jnp
from jax.experimental import pallas as pl
from jax.experimental.pallas import tpu as pltpu


_LANE = 128          # lane width (last dim of a vreg tile)
_SUBLANE_F32 = 8     # sublanes per vreg tile for 32-bit types

# Per-block VMEM budget.  Pallas double-buffers the input block AND the output
# block, so live VMEM ~= 4 x block bytes; 2 MiB blocks -> ~8 MiB live, safely
# inside every chip's scoped-VMEM default while already at ~85% of the HBM
# roofline for f32.
_BLOCK_BUDGET_BYTES = 2 << 20
# Aim for at least this many grid steps (pipelining + megacore sharding).
_MIN_GRID_STEPS = 8


def _round_up(x, m):
    return (x + m - 1) // m * m


def _sublane_pack(dtype):
    # Sub-32-bit dtypes pack along sublanes: 8 rows/f32, 16/bf16, 32/int8.
    return _SUBLANE_F32 * max(1, 4 // jnp.dtype(dtype).itemsize)


# ---------------------------------------------------------------------------
# Kernels
# ---------------------------------------------------------------------------
def _l2n_rows_kernel(x_ref, o_ref, *, eps):
    """Block (TM, D): L2-normalize each row (reduction over the lane axis)."""
    x = x_ref[...]
    xf = x.astype(jnp.float32)
    ss = jnp.sum(xf * xf, axis=-1, keepdims=True)          # (TM, 1), f32 accum
    # EUP reciprocal + broadcast multiply instead of a per-element VALU divide.
    inv = pl.reciprocal(jnp.sqrt(ss) + eps, approx=True)    # (TM, 1)
    o_ref[...] = (x * inv.astype(x.dtype)).astype(o_ref.dtype)


def _l2n_chan_kernel(x_ref, o_ref, *, eps):
    """Block (TB, C, TS): L2-normalize over the channel axis (axis=1)."""
    x = x_ref[...]
    xf = x.astype(jnp.float32)
    ss = jnp.sum(xf * xf, axis=1, keepdims=True)            # (TB, 1, TS), f32
    inv = pl.reciprocal(jnp.sqrt(ss) + eps, approx=True)    # (TB, 1, TS)
    o_ref[...] = (x * inv.astype(x.dtype)).astype(o_ref.dtype)


# ---------------------------------------------------------------------------
# Wrappers
# ---------------------------------------------------------------------------
def _l2n_2d(x, eps):
    """(N, D): normalize rows; D (reduction axis) stays whole per block."""
    N, D = int(x.shape[0]), int(x.shape[1])
    itemsize = jnp.dtype(x.dtype).itemsize
    # Padded VMEM bytes of one row (lane dim pads to a multiple of 128).
    row_bytes = _round_up(D, _LANE) * itemsize

    if N <= _SUBLANE_F32:
        tm = N                                   # full-extent block: always legal
    else:
        # Note: if one padded row ever exceeded the budget (D > ~500K f32) we
        # still take the minimal 8-row block -- D must stay whole (reduction).
        tm = max(_BLOCK_BUDGET_BYTES // max(row_bytes, 1), 1)
        tm = min(tm, N)
        # Keep >= ~_MIN_GRID_STEPS grid steps when the batch allows it.
        tm = min(tm, _round_up(pl.cdiv(N, _MIN_GRID_STEPS), _SUBLANE_F32))
        tm = max((tm // _SUBLANE_F32) * _SUBLANE_F32, _SUBLANE_F32)

    grid = (pl.cdiv(N, tm),)
    kern = functools.partial(_l2n_rows_kernel, eps=eps)
    return pl.pallas_call(
        kern,
        out_shape=jax.ShapeDtypeStruct((N, D), x.dtype),
        grid=grid,
        in_specs=[pl.BlockSpec((tm, D), lambda i: (i, 0))],
        out_specs=pl.BlockSpec((tm, D), lambda i: (i, 0)),
        compiler_params=pltpu.CompilerParams(
            dimension_semantics=("parallel",)),
    )(x)


def _l2n_nd(x, eps):
    """(B, C, *spatial): normalize over dim=1; spatial flattened onto lanes."""
    B, C = int(x.shape[0]), int(x.shape[1])
    S = 1
    for s in x.shape[2:]:
        S *= int(s)
    x3 = x.reshape(B, C, S)                      # pure reshape glue

    itemsize = jnp.dtype(x.dtype).itemsize
    c_pad = _round_up(C, _sublane_pack(x.dtype))     # sublane padding
    s_pad = _round_up(S, _LANE)                      # lane padding

    # --- spatial (lane) tiling: full S if its padded slab fits the budget,
    #     otherwise a multiple-of-128 slice of it (C stays whole: reduction).
    full_row_bytes = c_pad * s_pad * itemsize        # one batch elem, full S
    if full_row_bytes <= _BLOCK_BUDGET_BYTES:
        ts = S
        per_batch_bytes = full_row_bytes
    else:
        ts = max(_BLOCK_BUDGET_BYTES // (c_pad * _LANE * itemsize), 1) * _LANE
        if ts >= S:                                   # only when C alone is huge
            ts = S
        per_batch_bytes = c_pad * _round_up(ts, _LANE) * itemsize
    ns = pl.cdiv(S, ts)

    # --- batch (leading-axis) tiling: no (8,128) constraint on this dim.
    tb = max(_BLOCK_BUDGET_BYTES // max(per_batch_bytes, 1), 1)
    tb = min(tb, B)
    # Keep the total grid at >= ~_MIN_GRID_STEPS steps when shapes allow.
    want_b_steps = max(1, _MIN_GRID_STEPS // ns)
    tb = min(tb, max(1, pl.cdiv(B, want_b_steps)))
    nb = pl.cdiv(B, tb)

    kern = functools.partial(_l2n_chan_kernel, eps=eps)
    out3 = pl.pallas_call(
        kern,
        out_shape=jax.ShapeDtypeStruct((B, C, S), x.dtype),
        grid=(nb, ns),
        in_specs=[pl.BlockSpec((tb, C, ts), lambda i, j: (i, 0, j))],
        out_specs=pl.BlockSpec((tb, C, ts), lambda i, j: (i, 0, j)),
        compiler_params=pltpu.CompilerParams(
            dimension_semantics=("parallel", "parallel")),
    )(x3)
    return out3.reshape(x.shape)


def l2n_forward(x, eps=1e-6):
    """Pallas L2N: x / (||x||_2 over dim=1, keepdim) + eps)."""
    if x.ndim < 2:
        raise ValueError("L2N needs at least 2 dims (normalizes over dim=1).")
    if x.ndim == 2:
        return _l2n_2d(x, eps)
    return _l2n_nd(x, eps)


# ---------------------------------------------------------------------------
# Pure-JAX reference (matches torch.norm(p=2, dim=1, keepdim=True) semantics)
# ---------------------------------------------------------------------------
def l2n_reference(x, eps=1e-6):
    norm = jnp.sqrt(jnp.sum(x * x, axis=1, keepdims=True))
    return x / (norm + eps)


if __name__ == "__main__":
    key = jax.random.PRNGKey(0)
    k1, k2 = jax.random.split(key)

    # Tolerance is relaxed from 1e-5 because the EUP reciprocal (approx=True)
    # trades a few ULPs of precision for an otherwise-free divide.
    ATOL = RTOL = 2e-3

    # 4-D case: (B, C, H, W) -> normalize over the channel axis (dim=1).
    x4 = jax.random.normal(k1, (2, 4, 16, 16), jnp.float32)
    out4 = jax.block_until_ready(l2n_forward(x4))
    ref4 = l2n_reference(x4)
    assert out4.shape == x4.shape
    assert jnp.allclose(out4, ref4, atol=ATOL, rtol=RTOL), "4D mismatch vs reference"

    # 2-D case: (B, D) descriptor normalization (the most common L2N use).
    x2 = jax.random.normal(k2, (2, 512), jnp.float32)
    out2 = jax.block_until_ready(l2n_forward(x2))
    ref2 = l2n_reference(x2)
    assert out2.shape == x2.shape
    assert jnp.allclose(out2, ref2, atol=ATOL, rtol=RTOL), "2D mismatch vs reference"

    print("KERNEL_OK")
</pallas_src>

<mosaic_0001>
module attributes {stable_mosaic.version = 11 : i64} {
  func.func @_l2n_chan_kernel(%arg0: i32, %arg1: i32, %arg2: memref<1x4x256xf32, #tpu.memory_space<vmem>>, %arg3: memref<1x4x256xf32, #tpu.memory_space<vmem>>) attributes {dimension_semantics = [#tpu.dimension_semantics<parallel>, #tpu.dimension_semantics<parallel>], iteration_bounds = array<i64: 2, 1>, scalar_prefetch = 0 : i64, scratch_operands = 0 : i64, tpu.core_type = #tpu.core_type<tc>, window_params = [{transform_indices = @transform_0, window_bounds = array<i64: 1, 4, 256>}, {transform_indices = @transform_1, window_bounds = array<i64: 1, 4, 256>}]} {
    %c0 = arith.constant 0 : index
    %c0_0 = arith.constant 0 : index
    %c0_1 = arith.constant 0 : index
    %0 = vector.load %arg2[%c0, %c0_0, %c0_1] : memref<1x4x256xf32, #tpu.memory_space<vmem>>, vector<1x4x256xf32>
    %1 = arith.mulf %0, %0 : vector<1x4x256xf32>
    %cst = arith.constant dense<0.000000e+00> : vector<1x256xf32>
    %2 = vector.multi_reduction <add>, %1, %cst [1] : vector<1x4x256xf32> to vector<1x256xf32>
    %3 = vector.shape_cast %2 : vector<1x256xf32> to vector<1x1x256xf32>
    %4 = math.sqrt %3 : vector<1x1x256xf32>
    %cst_2 = arith.constant 9.99999997E-7 : f32
    %5 = vector.broadcast %cst_2 : f32 to vector<1x1x256xf32>
    %6 = arith.addf %4, %5 : vector<1x1x256xf32>
    %7 = tpu.reciprocal %6 {approx = true} : vector<1x1x256xf32> -> vector<1x1x256xf32>
    %8 = vector.broadcast %7 : vector<1x1x256xf32> to vector<1x4x256xf32>
    %9 = arith.mulf %0, %8 : vector<1x4x256xf32>
    %c0_3 = arith.constant 0 : index
    %c0_4 = arith.constant 0 : index
    %c0_5 = arith.constant 0 : index
    %10 = vector.load %arg3[%c0_3, %c0_4, %c0_5] : memref<1x4x256xf32, #tpu.memory_space<vmem>>, vector<1x4x256xf32>
    tpu.vector_store %arg3[%c0_3, %c0_4, %c0_5], %9 {strides = array<i32>} : memref<1x4x256xf32, #tpu.memory_space<vmem>>, vector<1x4x256xf32>,
    return
  }
  func.func @transform_0(%arg0: i32, %arg1: i32) -> (i32, i32, i32) {
    %c0_i32 = arith.constant 0 : i32
    %c0_i32_0 = arith.constant 0 : i32
    return %arg0, %c0_i32, %arg1 : i32, i32, i32
  }
  func.func @transform_1(%arg0: i32, %arg1: i32) -> (i32, i32, i32) {
    %c0_i32 = arith.constant 0 : i32
    %c0_i32_0 = arith.constant 0 : i32
    return %arg0, %c0_i32, %arg1 : i32, i32, i32
  }
}

</mosaic_0001>

<bundles_post_ra>
// kernel: tpu_custom_call.1
= control target key start
LH: loop header
LB: loop body
LE: loop exit
PB: predicated region body
PF: predicated region fallthrough
CT: control target
= control target key end

     0   :  { %6 = vsyncpa [#allocation3], 0  ;;  %s645_s0 = inlined_call_operand.hbm [shape: f32[2,4,256], index: 0, kind: input, shape index: {}]   ;;  %s646_s1 = inlined_call_operand.hbm [shape: f32[2,4,256], index: 1, kind: output, shape index: {}]  }
   0x1   :  { %8 = vsyncpa [#allocation3 + $0x1], 0 }
   0x2   :  { %9 = vsyncpa [#allocation4], 0 }
   0x3   :  { %11 = vsyncpa [#allocation4 + $0x1], 0  ;;  %s507_s6 = smov 0   ;;  %s509_s7 = smov 0  }
   0x4   :  { %s511_s8 = smov 0   ;;  %s513_s9 = smov 0  }
   0x5   :  { %s515_s10 = smov 0   ;;  %s517_s11 = smov 0  }
   0x6 LB: > { %s298_s12 = sadd.s32 4294967295, %s493_s11   ;;  %s299_s13 = sadd.s32 4294967294, %s493_s11   ;;  %s493_s11 = sphi %s517_s11, %s17_s11   ;;  %s489_s10 = sphi %s515_s10, %s658_s10   ;;  %s485_s9 = sphi %s513_s9, %s657_s9   ;;  %s481_s8 = sphi %s511_s8, %s656_s8   ;;  %s477_s7 = sphi %s509_s7, %s655_s7   ;;  %s473_s6 = sphi %s507_s6, %s654_s6  }
   0x7   : > { %s29_s14 = sadd.s32 1, %s489_s10  ;;  %s38_s15 = sadd.s32 1, %s481_s8 }
   0x8   : > { %p31_p0 = scmp.ge.s32.totalorder %s29_s14, 2  ;;  %p45_p1 = scmp.ne.s32.totalorder %s481_s8, %s477_s7 }
   0x9   : > { %p46_p2 = scmp.eq.s32.totalorder %s493_s11, 0  ;;  %p51_p3 = scmp.ne.s32.totalorder %s477_s7, %s473_s6 }
   0xa   : > { %s660_s14 = smov (%p31_p0, %s29_s14), 0  ;;  %p52_p5 = scmp.eq.s32.totalorder %s298_s12, 0 }
   0xb   : > { %p548_p4 = por %p46_p2, %p45_p1  ;;  %s33_s17 = ssub.s32 %s489_s10, %s660_s14 }
   0xc   : > { %p77_p6 = scmp.eq.s32.totalorder %s298_s12, 1  ;;  %p36_p7 = scmp.eq.s32.totalorder %s33_s17, 0 }
   0xd   : > { %p554_p8 = por %p52_p5, %p51_p3  ;;  %p83_p10 = scmp.eq.s32.totalorder %s299_s13, 1 }
   0xe   : > { %p558_p9 = por %p77_p6, %p45_p1  ;;  %p327_p13 = scmp.lt.s32.totalorder %s493_s11, 2 }
   0xf   : > { %s563_s20 = scalar_select %p36_p7, %s481_s8, %s38_s15  }
  0x10   : > { %p565_p11 = por %p83_p10, %p51_p3  ;;  %s103_s22 = sand.u32 1, %s481_s8  }
  0x11   : > { %s302_s23 = sshll.u32 %s103_s22, 3  ;;  %s313_s24 = sshll.u32 %s489_s10, 7 }
  0x12   : > { %s650_s21 = scalar_select %p565_p11, 1, 0 }
  0x13   : > { %s115_s27 = scalar_lea.hbm %s645_s0, %s313_s24  ;;  %s107_s28 = scalar_lea.vmem [#allocation2], %s302_s23 }
  0x14   : > { %s117_s29 = sshll.u32 %s107_s28, 4  ;;  %p578_p0 = pnand %p327_p13, %p548_p4  ;;  %s118_s29 = int_to_ptr.vmem [resolvable:$true] %s117_s29 }
  0x15   : > { %p305_p1 = scmp.ge.s32.totalorder %s493_s11, 1  ;;  %p122_p2 = scmp.lt.s32.totalorder %s493_s11, 3 }
  0x16   : > { %s104_s2 = scalar_lea.sflag [#allocation3], %s103_s22  ;;  %p387_p3 = pneg %p578_p0 }
  0x17   : > { %s398_s3 = scalar_lea.vmem %s118_s29, 128  ;;  %s495_s4 = smov [#allocation2]  }
  0x18   : > { %p399_p5 = scmp.ne.s32.totalorder %s118_s29, %s398_s3  ;;  %s403_s5 = sshll.u32 %s495_s4, 4  ;;  %s404_s5 = int_to_ptr.vmem [resolvable:$false] %s403_s5 }
  0x19   : > { %s405_s12 = scalar_lea.vmem %s404_s5, 256  ;;  %p406_p10 = scmp.lt.s32.totalorder %s118_s29, %s404_s5 }
  0x1a   : > { %p401_p6 = pnand %p399_p5, %p387_p3  ;;  %p407_p12 = scmp.lt.s32.totalorder %s405_s12, %s398_s3 }
  0x1c   : > { %p402_p7 = pneg %p401_p6  ;;  %p408_p4 = por %p407_p12, %p406_p10 }
  0x1e   : > { %p409_p13 = pnand %p408_p4, %p402_p7 }
  0x20   : > { %412 = shalt.err (!%p409_p13)
}
  0x21   : > { %322 = dma.hbm_to_vmem [thread:$0]  (!%p578_p0), %s115_s27, 128, %s118_s29, %s104_s2  }
  0x22   : > { %p123_p11 = pnand %p305_p1, %p122_p2 }
  0x23   : > { %s593_s13 = sand.u32 (!%p123_p11), 1, %s477_s7  }
  0x24   : > { %126 = sbr.rel (%p123_p11) target bundleno = 111 (0x6f), region = 24  ;;  %s306_s15 = sshll.u32 (!%p123_p11), %s593_s13, 3 }
  0x25   : > { %s129_s16 = scalar_lea.sflag (!%p123_p11), [#allocation3], %s593_s13  ;;  %s132_s17 = scalar_lea.vmem (!%p123_p11), [#allocation2], %s306_s15 }
  0x29   : > { %464 = dma.done.wait (%p554_p8), %s129_s16, 128  }
  0x2a   : > { %466 = vsyncadd (%p554_p8), %s129_s16, 4294967168  ;;  %v153_v0 = vld [vmem:[%s132_s17] sm:$0xff]  ;;  %vm158_vm0 = vcmask 1043456   ;;  %s150_s18 = scalar_lea.vmem [#allocation5], %s306_s15  ;;  %s314_s23 = sshll.u32 %s485_s9, 7 }
  0x2b   : > { %v154_v1 = vmul.f32 %v153_v0, %v153_v0  ;;  %s214_s22 = sshll.u32 %s150_s18, 4  ;;  %s212_s26 = scalar_lea.hbm %s646_s1, %s314_s23  ;;  %s215_s22 = int_to_ptr.vmem [resolvable:$true] %s214_s22 }
  0x2c   : > { %s198_s27 = scalar_lea.sflag [#allocation4], %s593_s13  ;;  %s413_s28 = scalar_lea.vmem %s215_s22, 128 }
  0x2d   : > { %v156_v2 = vcombine.high %v154_v1, %v154_v1  ;;  %v159_v3 = vsel %vm158_vm0, %v154_v1, 0.0  ;;  %p414_p8 = scmp.ne.s32.totalorder %s215_s22, %s413_s28  ;;  %s496_s29 = smov [#allocation5]  }
  0x2e   : > { %v160_v4 = vrot.slane %v159_v3, 4  ;;  %s417_s30 = sshll.u32 %s496_s29, 4  ;;  %s418_s30 = int_to_ptr.vmem [resolvable:$false] %s417_s30 }
  0x2f   : > { %v166_v5 = vsel %vm158_vm0, %v156_v2, 0.0  ;;  %p415_p11 = pnand %p414_p8, %p558_p9  ;;  %s419_s2 = scalar_lea.vmem %s418_s30, 256 }
  0x30   : > { %v161_v6 = vadd.f32 %v160_v4, %v159_v3  ;;  %v167_v7 = vrot.slane %v166_v5, 4  ;;  %p420_p0 = scmp.lt.s32.totalorder %s215_s22, %s418_s30  ;;  %p421_p1 = scmp.lt.s32.totalorder %s419_s2, %s413_s28 }
  0x31   : > { %p416_p12 = pneg %p415_p11 }
  0x32   : > { %v162_v8 = vrot.slane %v161_v6, 2  ;;  %v168_v9 = vadd.f32 %v167_v7, %v166_v5  ;;  %p422_p2 = por %p421_p1, %p420_p0 }
  0x34   : > { %v163_v10 = vadd.f32 %v162_v8, %v161_v6  ;;  %v169_v11 = vrot.slane %v168_v9, 2  ;;  %p423_p3 = pnand %p422_p2, %p416_p12 }
  0x36   : > { %v164_v12 = vrot.slane %v163_v10, 1  ;;  %v170_v13 = vadd.f32 %v169_v11, %v168_v9 }
  0x38   : > { %v165_v14 = vadd.f32 %v164_v12, %v163_v10  ;;  %v171_v15 = vrot.slane %v170_v13, 1 }
  0x3a   : > { %v172_v16 = vadd.f32 %v171_v15, %v170_v13  ;;  %377 = vrsqrt.f32 %v165_v14  ;;  %vm175_vm1 = vcmp.eq.f32.partialorder %v165_v14, inf  ;;  %v178_v18 = vand.u32 2147483648, %v165_v14 }
  0x3b   : > { %vm177_vm2 = vcmp.eq.f32.partialorder %v165_v14, 0.0 }
  0x3c   : > { %379 = vrsqrt.f32 %v172_v16  ;;  %vm182_vm3 = vcmp.eq.f32.partialorder %v172_v16, inf  ;;  %v185_v21 = vand.u32 2147483648, %v172_v16  ;;  %vm184_vm4 = vcmp.eq.f32.partialorder %v172_v16, 0.0 }
  0x47   : > { %v378_v17 = vpop.eup %377 }
  0x48   : > { %v174_v19 = vmul.f32 %v378_v17, %v165_v14 }
  0x49   : > { %v380_v20 = vpop.eup %379 }
  0x4a   : > { %v176_v22 = vsel %vm175_vm1, %v165_v14, %v174_v19  ;;  %v181_v23 = vmul.f32 %v380_v20, %v172_v16 }
  0x4b   : > { %v179_v24 = vsel %vm177_vm2, %v178_v18, %v176_v22 }
  0x4c   : > { %v183_v25 = vsel %vm182_vm3, %v172_v16, %v181_v23  ;;  %v187_v26 = vadd.f32 1e-06, %v179_v24 }
  0x4d   : > { %v186_v27 = vsel %vm184_vm4, %v185_v21, %v183_v25 }
  0x4e   : > { %v188_v28 = vadd.f32 1e-06, %v186_v27  ;;  %381 = vrcp.f32 %v187_v26 }
  0x50   : > { %383 = vrcp.f32 %v188_v28 }
  0x5b   : > { %v382_v29 = vpop.eup %381 }
  0x5d   : > { %v384_v30 = vpop.eup %383 }
  0x5e   : > { %v193_v31 = vcombine.low %v382_v29, %v384_v30 }
  0x60   : > { %v195_v32 = vmul.f32 %v193_v31, %v153_v0 }
  0x62   : > { %196 = vst [vmem:[%s150_s18] sm:$0xff] %v195_v32 }
  0x63   : > { %426 = shalt.err (!%p423_p3)
}
  0x64   : > { %s427_s9 = scalar_lea.hbm %s212_s26, 128  ;;  %s431_s5 = scalar_lea.hbm %s646_s1, 256 }
  0x65   : > { %p428_p5 = scmp.ne.s32.totalorder %s212_s26, %s427_s9  ;;  %p432_p10 = scmp.lt.s32.totalorder %s212_s26, %s646_s1 }
  0x66   : > { %p433_p4 = scmp.lt.s32.totalorder %s431_s5, %s427_s9 }
  0x67   : > { %p429_p6 = pnand %p428_p5, %p558_p9 }
  0x68   : > { %p434_p13 = por %p433_p4, %p432_p10 }
  0x69   : > { %p430_p7 = pneg %p429_p6 }
  0x6b   : > { %p435_p8 = pnand %p434_p13, %p430_p7 }
  0x6d   : > { %438 = shalt.err (!%p435_p8)
}
  0x6e   : > { %317 = dma.vmem_to_hbm [thread:$0]  (%p558_p9), %s215_s22, 128, %s212_s26, %s198_s27  }
  0x6f PF: > { %s226_s15 = sand.u32 1, %s473_s6   ;;  %p652_p11 = scmp.ne.s32.totalorder %s650_s21, 0 }
  0x70   : > { %p653_p12 = scmp.ge.s32.totalorder %s493_s11, 2  ;;  %s227_s16 = scalar_lea.sflag [#allocation4], %s226_s15 }
  0x72   : > { %p324_p0 = pnand %p653_p12, %p652_p11 }
  0x74   : > { %p325_p1 = pneg %p324_p0 }
  0x76   : > { %468 = dma.done.wait (%p325_p1), %s227_s16, 128  }
  0x77   : > { %470 = vsyncadd (%p325_p1), %s227_s16, 4294967168  ;;  %s17_s11 = sadd.s32 1, %s493_s11   ;;  %s654_s6 = smov %s477_s7 }
  0x78   : > { %p14_p2 = scmp.ge.s32.totalorder %s17_s11, 4   ;;  %s655_s7 = smov %s481_s8 }
  0x79   : > { %s656_s8 = smov %s563_s20  ;;  %s657_s9 = smov %s489_s10 }
  0x7a   : > { %s658_s10 = smov %s660_s14  ;;  %16 = sbr.rel (!%p14_p2) target bundleno = 6 (0x6), region = 69 }
  0x7f   :  { %232 = vsyncpa [#allocation3], 1 }
  0x80   :  { %234 = vsyncpa [#allocation3 + $0x1], 1 }
  0x81   :  { %235 = vsyncpa [#allocation4], 1 }
  0x82   :  { %237 = vsyncpa [#allocation4 + $0x1], 1 }

</bundles_post_ra>
